<compile_context>
chip_gen: v6e
topology: v6e:2x2x1
jax: 0.10.0
libtpu: 0.0.40
codegen_flags: <defaults>
</compile_context>

<pallas_src>
import functools

import jax
import jax.numpy as jnp
from jax import lax
from jax.experimental import pallas as pl
from jax.experimental.pallas import tpu as pltpu

LANE = 128  # vreg lane width


def _round_up(n, m):
    return ((n + m - 1) // m) * m


def encoder_kernel(x_ref, w1_ref, b1_ref, w2_ref, b2_ref, w3_ref, b3_ref,
                   o_ref):
    x = x_ref[...]

    # Layer 1: MXU matmul (f32 accumulation), bias + ReLU in f32 on the VPU.
    h1 = jnp.dot(x, w1_ref[...], preferred_element_type=jnp.float32)
    h1 = jnp.maximum(h1 + b1_ref[...].astype(jnp.float32), 0.0)
    h1 = h1.astype(w2_ref.dtype)

    # Layer 2: Linear + ReLU
    h2 = jnp.dot(h1, w2_ref[...], preferred_element_type=jnp.float32)
    h2 = jnp.maximum(h2 + b2_ref[...].astype(jnp.float32), 0.0)
    h2 = h2.astype(w3_ref.dtype)

    # Layer 3: Linear (no activation)
    out = jnp.dot(h2, w3_ref[...], preferred_element_type=jnp.float32)
    out = out + b3_ref[...].astype(jnp.float32)

    o_ref[...] = out.astype(o_ref.dtype)


def encoder_forward(x, params, *, batch_tile=512,
                    vmem_budget_bytes=32 * 1024 * 1024):
    """params = (w1, b1, w2, b2, w3, b3); w_i stored [in, out], b_i [1, out]."""
    w1, b1, w2, b2, w3, b3 = params
    B, D = x.shape
    H1, H2, L = w1.shape[1], w2.shape[1], w3.shape[1]

    # Lane-dense feature widths.  Hidden activations never touch HBM so the
    # padding is free; the padded latent columns are sliced off at the end.
    H1p, H2p, Lp = (_round_up(d, LANE) for d in (H1, H2, L))

    itemsize = jnp.dtype(x.dtype).itemsize
    sub = 8 * max(1, 4 // itemsize)            # 8 for f32, 16 for bf16
    tb = _round_up(max(sub, min(batch_tile, B)), sub)

    # Keep double-buffered x-in / out-writeback streams under the VMEM budget
    # (v7x: 64 MiB physical, ~32 MiB default scoped).
    def _stream_bytes(t):
        return 2 * t * D * itemsize + 2 * t * Lp * itemsize

    while tb > sub and _stream_bytes(tb) > vmem_budget_bytes:
        tb = max(sub, _round_up(tb // 2, sub))

    Bp = _round_up(B, tb)
    grid = (Bp // tb,)

    x_p = jnp.pad(x, ((0, Bp - B), (0, 0))) if Bp != B else x

    def _pad2(a, r, c):
        pr, pc = r - a.shape[0], c - a.shape[1]
        return jnp.pad(a, ((0, pr), (0, pc))) if (pr or pc) else a

    w1p, b1p = _pad2(w1, D, H1p), _pad2(b1, 1, H1p)
    w2p, b2p = _pad2(w2, H1p, H2p), _pad2(b2, 1, H2p)
    w3p, b3p = _pad2(w3, H2p, Lp), _pad2(b3, 1, Lp)

    weight_bytes = sum(int(a.size) * jnp.dtype(a.dtype).itemsize
                       for a in (w1p, b1p, w2p, b2p, w3p, b3p))
    flops = 2 * Bp * (D * H1p + H1p * H2p + H2p * Lp)
    bytes_accessed = Bp * D * itemsize + Bp * Lp * itemsize + weight_bytes
    vmem_limit = int(min(48 * 1024 * 1024,
                         max(16 * 1024 * 1024,
                             2 * (_stream_bytes(tb) + 2 * weight_bytes))))

    const = lambda shape: pl.BlockSpec(shape, lambda i: (0, 0))

    out_p = pl.pallas_call(
        encoder_kernel,
        out_shape=jax.ShapeDtypeStruct((Bp, Lp), x.dtype),
        grid_spec=pltpu.PrefetchScalarGridSpec(
            num_scalar_prefetch=0,
            grid=grid,
            in_specs=[
                pl.BlockSpec((tb, D), lambda i: (i, 0)),   # streamed x tile
                const((D, H1p)), const((1, H1p)),          # layer 1 (resident)
                const((H1p, H2p)), const((1, H2p)),        # layer 2 (resident)
                const((H2p, Lp)), const((1, Lp)),          # layer 3 (resident)
            ],
            out_specs=pl.BlockSpec((tb, Lp), lambda i: (i, 0)),
        ),
        compiler_params=pltpu.CompilerParams(
            dimension_semantics=("parallel",),
            vmem_limit_bytes=vmem_limit),
        cost_estimate=pl.CostEstimate(
            flops=flops, transcendentals=0, bytes_accessed=bytes_accessed),
    )(x_p, w1p, b1p, w2p, b2p, w3p, b3p)

    return out_p[:B, :L]


def init_encoder_params(key, input_dim, latent_dim, dtype=jnp.float32):
    """Deterministic init (uniform, PyTorch-default Linear scale)."""
    dims = [input_dim, input_dim // 2, input_dim // 4, latent_dim]
    params = []
    for fan_in, fan_out in zip(dims[:-1], dims[1:]):
        key, kw, kb = jax.random.split(key, 3)
        bound = 1.0 / (fan_in ** 0.5)
        # Stored as [in, out] (transposed relative to PyTorch's [out, in]).
        w = jax.random.uniform(kw, (fan_in, fan_out), jnp.float32,
                               minval=-bound, maxval=bound).astype(dtype)
        b = jax.random.uniform(kb, (1, fan_out), jnp.float32,
                               minval=-bound, maxval=bound).astype(dtype)
        params += [w, b]
    return tuple(params)


def encoder_reference(x, params):
    w1, b1, w2, b2, w3, b3 = [p.astype(jnp.float32) for p in params]
    x = x.astype(jnp.float32)
    dot = functools.partial(jnp.dot, precision=lax.Precision.HIGHEST)
    h1 = jnp.maximum(dot(x, w1) + b1, 0.0)
    h2 = jnp.maximum(dot(h1, w2) + b2, 0.0)
    return dot(h2, w3) + b3


if __name__ == "__main__":
    key = jax.random.PRNGKey(0)
    input_dim, latent_dim = 64, 16          # hidden dims: 32, 16

    kx, kp, kx2 = jax.random.split(key, 3)

    # ---- f32 path: multi-step batch grid (pipelined, dual-TC shardable) ----
    B = 1024
    x = jax.random.normal(kx, (B, input_dim), jnp.float32)
    params = init_encoder_params(kp, input_dim, latent_dim, jnp.float32)

    out = jax.block_until_ready(encoder_forward(x, params, batch_tile=256))
    ref = encoder_reference(x, params)
    assert out.shape == (B, latent_dim)
    assert jnp.allclose(out, ref, atol=1e-4, rtol=1e-4), "f32 mismatch"

    # ---- ragged batch (exercises zero-row padding + slice-back) ----
    B2 = 200
    x2 = jax.random.normal(kx2, (B2, input_dim), jnp.float32)
    out2 = jax.block_until_ready(encoder_forward(x2, params, batch_tile=64))
    ref2 = encoder_reference(x2, params)
    assert out2.shape == (B2, latent_dim)
    assert jnp.allclose(out2, ref2, atol=1e-4, rtol=1e-4), "ragged mismatch"

    # ---- bf16 weights/activations (MXU-native), f32 accumulation ----
    xb = x.astype(jnp.bfloat16)
    params_b = tuple(p.astype(jnp.bfloat16) for p in params)
    outb = jax.block_until_ready(encoder_forward(xb, params_b, batch_tile=256))
    assert outb.shape == (B, latent_dim)
    assert jnp.allclose(outb.astype(jnp.float32), ref,
                        atol=5e-2, rtol=5e-2), "bf16 mismatch"

    print("KERNEL_OK")
</pallas_src>

<mosaic_0001>
module attributes {stable_mosaic.version = 11 : i64} {
  func.func @encoder_kernel(%arg0: i32, %arg1: memref<256x64xf32, #tpu.memory_space<vmem>>, %arg2: memref<64x128xf32, #tpu.memory_space<vmem>>, %arg3: memref<1x128xf32, #tpu.memory_space<vmem>>, %arg4: memref<128x128xf32, #tpu.memory_space<vmem>>, %arg5: memref<1x128xf32, #tpu.memory_space<vmem>>, %arg6: memref<128x128xf32, #tpu.memory_space<vmem>>, %arg7: memref<1x128xf32, #tpu.memory_space<vmem>>, %arg8: memref<256x128xf32, #tpu.memory_space<vmem>>) attributes {dimension_semantics = [#tpu.dimension_semantics<parallel>], iteration_bounds = array<i64: 4>, scalar_prefetch = 0 : i64, scratch_operands = 0 : i64, tpu.core_type = #tpu.core_type<tc>, window_params = [{transform_indices = @transform_0, window_bounds = array<i64: 256, 64>}, {pipeline_mode = #tpu.pipeline_mode<synchronous>, transform_indices = @transform_1, window_bounds = array<i64: 64, 128>}, {pipeline_mode = #tpu.pipeline_mode<synchronous>, transform_indices = @transform_2, window_bounds = array<i64: 1, 128>}, {pipeline_mode = #tpu.pipeline_mode<synchronous>, transform_indices = @transform_3, window_bounds = array<i64: 128, 128>}, {pipeline_mode = #tpu.pipeline_mode<synchronous>, transform_indices = @transform_4, window_bounds = array<i64: 1, 128>}, {pipeline_mode = #tpu.pipeline_mode<synchronous>, transform_indices = @transform_5, window_bounds = array<i64: 128, 128>}, {pipeline_mode = #tpu.pipeline_mode<synchronous>, transform_indices = @transform_6, window_bounds = array<i64: 1, 128>}, {transform_indices = @transform_7, window_bounds = array<i64: 256, 128>}]} {
    %c0 = arith.constant 0 : index
    %c0_0 = arith.constant 0 : index
    %0 = vector.load %arg1[%c0, %c0_0] : memref<256x64xf32, #tpu.memory_space<vmem>>, vector<256x64xf32>
    %c0_1 = arith.constant 0 : index
    %c0_2 = arith.constant 0 : index
    %1 = vector.load %arg2[%c0_1, %c0_2] : memref<64x128xf32, #tpu.memory_space<vmem>>, vector<64x128xf32>
    %cst = arith.constant dense<0.000000e+00> : vector<256x128xf32>
    %2 = tpu.matmul %0, %1, %cst {dimension_numbers = #tpu.dot_dimension_numbers<[1], [0], [0], [1], [0, 0, 1, 1], [], []>} : vector<256x64xf32>, vector<64x128xf32>, vector<256x128xf32> -> vector<256x128xf32>
    %c0_3 = arith.constant 0 : index
    %c0_4 = arith.constant 0 : index
    %3 = vector.load %arg3[%c0_3, %c0_4] : memref<1x128xf32, #tpu.memory_space<vmem>>, vector<1x128xf32>
    %4 = vector.broadcast %3 : vector<1x128xf32> to vector<256x128xf32>
    %5 = arith.addf %2, %4 : vector<256x128xf32>
    %cst_5 = arith.constant 0.000000e+00 : f32
    %6 = vector.broadcast %cst_5 : f32 to vector<256x128xf32>
    %7 = arith.maximumf %5, %6 : vector<256x128xf32>
    %c0_6 = arith.constant 0 : index
    %c0_7 = arith.constant 0 : index
    %8 = vector.load %arg4[%c0_6, %c0_7] : memref<128x128xf32, #tpu.memory_space<vmem>>, vector<128x128xf32>
    %cst_8 = arith.constant dense<0.000000e+00> : vector<256x128xf32>
    %9 = tpu.matmul %7, %8, %cst_8 {dimension_numbers = #tpu.dot_dimension_numbers<[1], [0], [0], [1], [0, 0, 1, 1], [], []>} : vector<256x128xf32>, vector<128x128xf32>, vector<256x128xf32> -> vector<256x128xf32>
    %c0_9 = arith.constant 0 : index
    %c0_10 = arith.constant 0 : index
    %10 = vector.load %arg5[%c0_9, %c0_10] : memref<1x128xf32, #tpu.memory_space<vmem>>, vector<1x128xf32>
    %11 = vector.broadcast %10 : vector<1x128xf32> to vector<256x128xf32>
    %12 = arith.addf %9, %11 : vector<256x128xf32>
    %cst_11 = arith.constant 0.000000e+00 : f32
    %13 = vector.broadcast %cst_11 : f32 to vector<256x128xf32>
    %14 = arith.maximumf %12, %13 : vector<256x128xf32>
    %c0_12 = arith.constant 0 : index
    %c0_13 = arith.constant 0 : index
    %15 = vector.load %arg6[%c0_12, %c0_13] : memref<128x128xf32, #tpu.memory_space<vmem>>, vector<128x128xf32>
    %cst_14 = arith.constant dense<0.000000e+00> : vector<256x128xf32>
    %16 = tpu.matmul %14, %15, %cst_14 {dimension_numbers = #tpu.dot_dimension_numbers<[1], [0], [0], [1], [0, 0, 1, 1], [], []>} : vector<256x128xf32>, vector<128x128xf32>, vector<256x128xf32> -> vector<256x128xf32>
    %c0_15 = arith.constant 0 : index
    %c0_16 = arith.constant 0 : index
    %17 = vector.load %arg7[%c0_15, %c0_16] : memref<1x128xf32, #tpu.memory_space<vmem>>, vector<1x128xf32>
    %18 = vector.broadcast %17 : vector<1x128xf32> to vector<256x128xf32>
    %19 = arith.addf %16, %18 : vector<256x128xf32>
    %c0_17 = arith.constant 0 : index
    %c0_18 = arith.constant 0 : index
    %20 = vector.load %arg8[%c0_17, %c0_18] : memref<256x128xf32, #tpu.memory_space<vmem>>, vector<256x128xf32>
    tpu.vector_store %arg8[%c0_17, %c0_18], %19 {strides = array<i32>} : memref<256x128xf32, #tpu.memory_space<vmem>>, vector<256x128xf32>,
    return
  }
  func.func @transform_0(%arg0: i32) -> (i32, i32) {
    %c0_i32 = arith.constant 0 : i32
    %c0_i32_0 = arith.constant 0 : i32
    return %arg0, %c0_i32 : i32, i32
  }
  func.func @transform_1(%arg0: i32) -> (i32, i32) {
    %c0_i32 = arith.constant 0 : i32
    %c0_i32_0 = arith.constant 0 : i32
    %c0_i32_1 = arith.constant 0 : i32
    return %c0_i32, %c0_i32_0 : i32, i32
  }
  func.func @transform_2(%arg0: i32) -> (i32, i32) {
    %c0_i32 = arith.constant 0 : i32
    %c0_i32_0 = arith.constant 0 : i32
    %c0_i32_1 = arith.constant 0 : i32
    return %c0_i32, %c0_i32_0 : i32, i32
  }
  func.func @transform_3(%arg0: i32) -> (i32, i32) {
    %c0_i32 = arith.constant 0 : i32
    %c0_i32_0 = arith.constant 0 : i32
    %c0_i32_1 = arith.constant 0 : i32
    return %c0_i32, %c0_i32_0 : i32, i32
  }
  func.func @transform_4(%arg0: i32) -> (i32, i32) {
    %c0_i32 = arith.constant 0 : i32
    %c0_i32_0 = arith.constant 0 : i32
    %c0_i32_1 = arith.constant 0 : i32
    return %c0_i32, %c0_i32_0 : i32, i32
  }
  func.func @transform_5(%arg0: i32) -> (i32, i32) {
    %c0_i32 = arith.constant 0 : i32
    %c0_i32_0 = arith.constant 0 : i32
    %c0_i32_1 = arith.constant 0 : i32
    return %c0_i32, %c0_i32_0 : i32, i32
  }
  func.func @transform_6(%arg0: i32) -> (i32, i32) {
    %c0_i32 = arith.constant 0 : i32
    %c0_i32_0 = arith.constant 0 : i32
    %c0_i32_1 = arith.constant 0 : i32
    return %c0_i32, %c0_i32_0 : i32, i32
  }
  func.func @transform_7(%arg0: i32) -> (i32, i32) {
    %c0_i32 = arith.constant 0 : i32
    %c0_i32_0 = arith.constant 0 : i32
    return %arg0, %c0_i32 : i32, i32
  }
}

</mosaic_0001>

<bundles_post_ra>
// kernel: tpu_custom_call.1
= control target key start
LH: loop header
LB: loop body
LE: loop exit
PB: predicated region body
PF: predicated region fallthrough
CT: control target
= control target key end

     0   :  { %12 = vsyncpa [#allocation3], 0  ;;  %s2333_s0 = inlined_call_operand.vmem [shape: f32[1024,64], index: 0, kind: input, shape index: {}]   ;;  %s2334_s1 = inlined_call_operand.vmem [shape: f32[64,128], index: 1, kind: input, shape index: {}]   ;;  %s2335_s2 = inlined_call_operand.vmem [shape: f32[1,128], index: 2, kind: input, shape index: {}]   ;;  %s2336_s3 = inlined_call_operand.vmem [shape: f32[128,128], index: 3, kind: input, shape index: {}]   ;;  %s2337_s4 = inlined_call_operand.vmem [shape: f32[1,128], index: 4, kind: input, shape index: {}]   ;;  %s2338_s5 = inlined_call_operand.vmem [shape: f32[128,128], index: 5, kind: input, shape index: {}]   ;;  %s2339_s6 = inlined_call_operand.vmem [shape: f32[1,128], index: 6, kind: input, shape index: {}]   ;;  %s2340_s7 = inlined_call_operand.hbm [shape: f32[1024,128], index: 7, kind: output, shape index: {}]  }
   0x1   :  { %14 = vsyncpa [#allocation3 + $0x1], 0  ;;  %s1887_s24 = smov 0   ;;  %s1889_s25 = smov 0  }
   0x2   :  { %s1891_s26 = smov 0   ;;  %s1893_s27 = smov 0  }
   0x3 LB: > { %s1908_s28 = sadd.s32 4294967295, %s1842_s27   ;;  %s1317_s29 = sadd.s32 4294967294, %s1842_s27   ;;  %s1842_s27 = sphi %s1893_s27, %s2346_s27   ;;  %s1838_s26 = sphi %s1891_s26, %s2345_s26   ;;  %s1834_s25 = sphi %s1889_s25, %s2344_s25   ;;  %s1830_s24 = sphi %s1887_s24, %s2343_s24  }
   0x4   : > { %s1912_s30 = sadd.s32 1, %s1842_s27   ;;  %s179_s8 = sadd.s32 1, %s1838_s26 }
   0x5   : > { %s176_s9 = ssub.s32 %s1842_s27, %s1912_s30  ;;  %p189_p0 = scmp.ne.s32.totalorder %s1838_s26, %s1834_s25 }
   0x6   : > { %p177_p1 = scmp.eq.s32.totalorder %s176_s9, 0  ;;  %p190_p2 = scmp.eq.s32.totalorder %s1908_s28, 3 }
   0x7   : > { %p195_p3 = scmp.ne.s32.totalorder %s1834_s25, %s1830_s24  ;;  %p196_p4 = scmp.eq.s32.totalorder %s1317_s29, 3 }
   0x8   : > { %s1923_s10 = scalar_select %p177_p1, %s1838_s26, %s179_s8  }
   0x9   : > { %p1925_p5 = por %p190_p2, %p189_p0  ;;  %p1929_p6 = por %p196_p4, %p195_p3 }
   0xa   : > { %p1320_p7 = scmp.ge.s32.totalorder %s1842_s27, 1  ;;  %p241_p8 = scmp.lt.s32.totalorder %s1842_s27, 5 }
   0xc   : > { %p242_p9 = pnand %p1320_p7, %p241_p8 }
   0xd   : > { %s1322_s17 = sshll.u32 (!%p242_p9), %s1908_s28, 5  ;;  %s270_s20 = sand.u32 (!%p242_p9), 1, %s1834_s25  }
   0xe   : > { %245 = sbr.rel (%p242_p9) target bundleno = 707 (0x2c3), region = 48  ;;  %p274_p10 = scmp.lt.s32.totalorder (!%p242_p9), %s1322_s17, 127 }
   0xf   : > { %s1321_s21 = sshll.u32 (!%p242_p9), %s270_s20, 8  ;;  %s1364_s8 = sshll.u32 (!%p242_p9), %s1908_s28, 12 }
  0x10   : > { %s2217_s29 = scalar_lea.vmem (!%p242_p9), [#allocation2], %s1321_s21  ;;  %s2284_s15 = scalar_lea.hbm (!%p242_p9), %s2340_s7, %s1364_s8 }
  0x11   : > { %s2293_s28 = scalar_lea.sflag (!%p242_p9), [#allocation3], %s270_s20 }
  0x13   : > { %v319_v0 = vld [vmem:[%s2334_s1 + $0x38] sm:$0xff]  ;;  %v318_v1 = vld [vmem:[%s2334_s1 + $0x30] sm:$0xff]  ;;  %v317_v2 = vld [vmem:[%s2334_s1 + $0x28] sm:$0xff]  ;;  %s2348_s17 = smov (!%p274_p10, %s1322_s17), 127  ;;  %vm327_vm0 = vcmask 523264  }
  0x14   : > { %1501 = vmatprep.subr.mxu0 %v319_v0  ;;  %1725 = vmatprep.subr.mxu1 %v319_v0  ;;  %v316_v3 = vld [vmem:[%s2334_s1 + $0x20] sm:$0xff]  ;;  %s1323_s22 = sshll.u32 %s2348_s17, 3  ;;  %v315_v4 = vld [vmem:[%s2334_s1 + $0x18] sm:$0xff]  ;;  %v314_v6 = vld [vmem:[%s2334_s1 + $0x10] sm:$0xff]  ;;  %s1844_s17 = smov [#allocation2]  }
  0x15   : > { %1502 = vmatpush3.msra.mxu0 %v319_v0  ;;  %1733 = vmatpush3.msra.mxu1 %v319_v0  ;;  %s1954_s13 = scalar_lea.vmem %s2333_s0, %s1323_s22  ;;  %v313_v7 = vld [vmem:[%s2334_s1 + $0x8] sm:$0xff]  ;;  %v312_v8 = vld [vmem:[%s2334_s1] sm:$0xff]  ;;  %v696_v13 = vld [vmem:[%s2336_s3 + $0x78] sm:$0xff]  ;;  %s1786_s18 = sshll.u32 %s1844_s17, 4  ;;  %s1787_s18 = int_to_ptr.vmem [resolvable:$false] %s1786_s18 }
  0x16   : > { %1503 = vmatprep.subr.mxu0 %v318_v1  ;;  %1726 = vmatprep.subr.mxu1 %v318_v1  ;;  %v280_v5 = vld [vmem:[%s1954_s13] sm:$0xff]  ;;  %v281_v9 = vld [vmem:[%s1954_s13 + $0x8] sm:$0xff]  ;;  %v282_v10 = vld [vmem:[%s1954_s13 + $0x10] sm:$0xff]  ;;  %s1788_s19 = scalar_lea.vmem %s1787_s18, 8192 }
  0x17   : > { %1504 = vmatpush3.msra.mxu0 %v318_v1  ;;  %1734 = vmatpush3.msra.mxu1 %v318_v1  ;;  %v296_v11 = vld [vmem:[%s1954_s13 + $0x80] sm:$0xff]  ;;  %v297_v12 = vld [vmem:[%s1954_s13 + $0x88] sm:$0xff]  ;;  %v298_v14 = vld [vmem:[%s1954_s13 + $0x90] sm:$0xff] }
  0x18   : > { %1505 = vmatprep.subr.mxu0 %v317_v2  ;;  %1727 = vmatprep.subr.mxu1 %v317_v2  ;;  %v283_v15 = vld [vmem:[%s1954_s13 + $0x18] sm:$0xff]  ;;  %v695_v16 = vld [vmem:[%s2336_s3 + $0x70] sm:$0xff]  ;;  %v284_v17 = vld [vmem:[%s1954_s13 + $0x20] sm:$0xff] }
  0x19   : > { %1506 = vmatpush3.msra.mxu0 %v317_v2  ;;  %1735 = vmatpush3.msra.mxu1 %v317_v2  ;;  %v299_v18 = vld [vmem:[%s1954_s13 + $0x98] sm:$0xff]  ;;  %v694_v19 = vld [vmem:[%s2336_s3 + $0x68] sm:$0xff]  ;;  %v300_v20 = vld [vmem:[%s1954_s13 + $0xa0] sm:$0xff] }
  0x1a   : > { %1507 = vmatprep.subr.mxu0 %v316_v3  ;;  %1728 = vmatprep.subr.mxu1 %v316_v3  ;;  %v285_v21 = vld [vmem:[%s1954_s13 + $0x28] sm:$0xff]  ;;  %v693_v22 = vld [vmem:[%s2336_s3 + $0x60] sm:$0xff]  ;;  %v286_v23 = vld [vmem:[%s1954_s13 + $0x30] sm:$0xff] }
  0x1b   : > { %1508 = vmatpush3.msra.mxu0 %v316_v3  ;;  %1517 = vmatprep.mubr.msk.f32.mxu0 %vm327_vm0, %v280_v5  ;;  %v301_v24 = vld [vmem:[%s1954_s13 + $0xa8] sm:$0xff]  ;;  %v692_v25 = vld [vmem:[%s2336_s3 + $0x58] sm:$0xff]  ;;  %v302_v26 = vld [vmem:[%s1954_s13 + $0xb0] sm:$0xff] }
  0x1c   : > { %1509 = vmatprep.subr.mxu0 %v315_v4  ;;  %1736 = vmatpush3.msra.mxu1 %v316_v3  ;;  %v287_v27 = vld [vmem:[%s1954_s13 + $0x38] sm:$0xff]  ;;  %v691_v28 = vld [vmem:[%s2336_s3 + $0x50] sm:$0xff]  ;;  %v288_v29 = vld [vmem:[%s1954_s13 + $0x40] sm:$0xff] }
  0x1d   : > { %1510 = vmatpush3.msra.mxu0 %v315_v4  ;;  %1729 = vmatprep.subr.mxu1 %v315_v4  ;;  %v303_v30 = vld [vmem:[%s1954_s13 + $0xb8] sm:$0xff]  ;;  %v690_v31 = vld [vmem:[%s2336_s3 + $0x48] sm:$0xff]  ;;  %v304_v32 = vld [vmem:[%s1954_s13 + $0xc0] sm:$0xff] }
  0x1e   : > { %1511 = vmatprep.subr.mxu0 %v314_v6  ;;  %1737 = vmatpush3.msra.mxu1 %v315_v4  ;;  %v289_v33 = vld [vmem:[%s1954_s13 + $0x48] sm:$0xff]  ;;  %v689_v34 = vld [vmem:[%s2336_s3 + $0x40] sm:$0xff]  ;;  %v290_v35 = vld [vmem:[%s1954_s13 + $0x50] sm:$0xff] }
  0x1f   : > { %1512 = vmatpush3.msra.mxu0 %v314_v6  ;;  %1730 = vmatprep.subr.mxu1 %v314_v6  ;;  %v305_v36 = vld [vmem:[%s1954_s13 + $0xc8] sm:$0xff]  ;;  %v688_v37 = vld [vmem:[%s2336_s3 + $0x38] sm:$0xff]  ;;  %v306_v38 = vld [vmem:[%s1954_s13 + $0xd0] sm:$0xff] }
  0x20   : > { %1513 = vmatprep.subr.mxu0 %v313_v7  ;;  %1738 = vmatpush3.msra.mxu1 %v314_v6  ;;  %v291_v39 = vld [vmem:[%s1954_s13 + $0x58] sm:$0xff]  ;;  %v687_v40 = vld [vmem:[%s2336_s3 + $0x30] sm:$0xff]  ;;  %v292_v41 = vld [vmem:[%s1954_s13 + $0x60] sm:$0xff] }
  0x21   : > { %1514 = vmatpush3.msra.mxu0 %v313_v7  ;;  %1731 = vmatprep.subr.mxu1 %v313_v7  ;;  %v307_v42 = vld [vmem:[%s1954_s13 + $0xd8] sm:$0xff]  ;;  %v686_v43 = vld [vmem:[%s2336_s3 + $0x28] sm:$0xff]  ;;  %v308_v44 = vld [vmem:[%s1954_s13 + $0xe0] sm:$0xff] }
  0x22   : > { %1515 = vmatprep.subr.mxu0 %v312_v8  ;;  %1739 = vmatpush3.msra.mxu1 %v313_v7  ;;  %v293_v45 = vld [vmem:[%s1954_s13 + $0x68] sm:$0xff]  ;;  %v685_v46 = vld [vmem:[%s2336_s3 + $0x20] sm:$0xff]  ;;  %v294_v47 = vld [vmem:[%s1954_s13 + $0x70] sm:$0xff] }
  0x23   : > { %1516 = vmatpush3.msra.mxu0 %v312_v8  ;;  %1732 = vmatprep.subr.mxu1 %v312_v8  ;;  %v309_v48 = vld [vmem:[%s1954_s13 + $0xe8] sm:$0xff]  ;;  %v684_v49 = vld [vmem:[%s2336_s3 + $0x18] sm:$0xff]  ;;  %v310_v50 = vld [vmem:[%s1954_s13 + $0xf0] sm:$0xff] }
  0x24   : > { %1518 = vmatmul.mubr.msk.f32.vlgmr.msra.gmra.mxu0 %vm327_vm0, %v281_v9  ;;  %1740 = vmatpush3.msra.mxu1 %v312_v8  ;;  %v295_v51 = vld [vmem:[%s1954_s13 + $0x78] sm:$0xff]  ;;  %v683_v53 = vld [vmem:[%s2336_s3 + $0x10] sm:$0xff]  ;;  %v682_v54 = vld [vmem:[%s2336_s3 + $0x8] sm:$0xff] }
  0x25   : > { %1520 = vmatprep.mubr.msk.f32.mxu0 %vm327_vm0, %v282_v10  ;;  %1541 = vmatprep.mubr.msk.f32.mxu1 %vm327_vm0, %v296_v11  ;;  %v311_v52 = vld [vmem:[%s1954_s13 + $0xf8] sm:$0xff]  ;;  %v681_v55 = vld [vmem:[%s2336_s3] sm:$0xff]  ;;  %v975_v57 = vld [vmem:[%s2338_s5 + $0x70] sm:$0xff]  ;;  %s1255_s13 = sshll.u32 %s2217_s29, 4  ;;  %s2286_s13 = int_to_ptr.vmem [resolvable:$true] %s1255_s13 }
  0x26   : > { %1542 = vmatmul.mubr.msk.f32.vlgmr.msra.gmra.mxu1 %vm327_vm0, %v297_v12  ;;  %1565 = vmatprep.subr.mxu1 %v696_v13  ;;  %v976_v56 = vld [vmem:[%s2338_s5 + $0x78] sm:$0xff]  ;;  %v974_v58 = vld [vmem:[%s2338_s5 + $0x68] sm:$0xff]  ;;  %v973_v59 = vld [vmem:[%s2338_s5 + $0x60] sm:$0xff]  ;;  %s1782_s16 = scalar_lea.vmem %s2286_s13, 4096  ;;  %p1789_p0 = scmp.lt.s32.totalorder %s2286_s13, %s1787_s18 }
  0x27   : > { %1544 = vmatprep.mubr.msk.f32.mxu1 %vm327_vm0, %v298_v14  ;;  %1566 = vmatpush3.msra.mxu1 %v696_v13  ;;  %v972_v60 = vld [vmem:[%s2338_s5 + $0x58] sm:$0xff]  ;;  %v971_v61 = vld [vmem:[%s2338_s5 + $0x50] sm:$0xff]  ;;  %v970_v62 = vld [vmem:[%s2338_s5 + $0x48] sm:$0xff]  ;;  %p1783_p11 = scmp.ne.s32.totalorder %s2286_s13, %s1782_s16  ;;  %p1790_p1 = scmp.lt.s32.totalorder %s1788_s19, %s1782_s16 }
  0x28   : > { %1521 = vmatmul.mubr.msk.f32.gmra.mxu0 %vm327_vm0, %v283_v15  ;;  %1567 = vmatprep.subr.mxu1 %v695_v16  ;;  %v969_v63 = vld [vmem:[%s2338_s5 + $0x40] sm:$0xff]  ;;  %v968_v0 = vld [vmem:[%s2338_s5 + $0x38] sm:$0xff]  ;;  %v967_v1 = vld [vmem:[%s2338_s5 + $0x30] sm:$0xff] }
  0x29   : > { %1523 = vmatprep.mubr.msk.f32.mxu0 %vm327_vm0, %v284_v17  ;;  %1568 = vmatpush3.msra.mxu1 %v695_v16  ;;  %v966_v2 = vld [vmem:[%s2338_s5 + $0x28] sm:$0xff]  ;;  %v965_v3 = vld [vmem:[%s2338_s5 + $0x20] sm:$0xff]  ;;  %v964_v4 = vld [vmem:[%s2338_s5 + $0x18] sm:$0xff]  ;;  %p1784_p12 = pnand %p1783_p11, %p1925_p5  ;;  %p1791_p2 = por %p1790_p1, %p1789_p0 }
  0x2a   : > { %1545 = vmatmul.mubr.msk.f32.gmra.mxu1 %vm327_vm0, %v299_v18  ;;  %1569 = vmatprep.subr.mxu1 %v694_v19  ;;  %v2119_v5 = vld [vmem:[%s2335_s2] ss:$0 sm:$0xff] }
  0x2b   : > { %1547 = vmatprep.mubr.msk.f32.mxu1 %vm327_vm0, %v300_v20  ;;  %1570 = vmatpush3.msra.mxu1 %v694_v19  ;;  %p1785_p13 = pneg %p1784_p12 }
  0x2c   : > { %1524 = vmatmul.mubr.msk.f32.gmra.mxu0 %vm327_vm0, %v285_v21  ;;  %1571 = vmatprep.subr.mxu1 %v693_v22 }
  0x2d   : > { %1526 = vmatprep.mubr.msk.f32.mxu0 %vm327_vm0, %v286_v23  ;;  %1572 = vmatpush3.msra.mxu1 %v693_v22  ;;  %p1792_p3 = pnand %p1791_p2, %p1785_p13 }
  0x2e   : > { %1548 = vmatmul.mubr.msk.f32.gmra.mxu1 %vm327_vm0, %v301_v24  ;;  %1573 = vmatprep.subr.mxu1 %v692_v25 }
  0x2f   : > { %1550 = vmatprep.mubr.msk.f32.mxu1 %vm327_vm0, %v302_v26  ;;  %1574 = vmatpush3.msra.mxu1 %v692_v25 }
  0x30   : > { %1527 = vmatmul.mubr.msk.f32.gmra.mxu0 %vm327_vm0, %v287_v27  ;;  %1575 = vmatprep.subr.mxu1 %v691_v28 }
  0x31   : > { %1529 = vmatprep.mubr.msk.f32.mxu0 %vm327_vm0, %v288_v29  ;;  %1576 = vmatpush3.msra.mxu1 %v691_v28 }
  0x32   : > { %1551 = vmatmul.mubr.msk.f32.gmra.mxu1 %vm327_vm0, %v303_v30  ;;  %1577 = vmatprep.subr.mxu1 %v690_v31 }
  0x33   : > { %1553 = vmatprep.mubr.msk.f32.mxu1 %vm327_vm0, %v304_v32  ;;  %1578 = vmatpush3.msra.mxu1 %v690_v31 }
  0x34   : > { %1530 = vmatmul.mubr.msk.f32.gmra.mxu0 %vm327_vm0, %v289_v33  ;;  %1579 = vmatprep.subr.mxu1 %v689_v34 }
  0x35   : > { %1532 = vmatprep.mubr.msk.f32.mxu0 %vm327_vm0, %v290_v35  ;;  %1580 = vmatpush3.msra.mxu1 %v689_v34 }
  0x36   : > { %1554 = vmatmul.mubr.msk.f32.gmra.mxu1 %vm327_vm0, %v305_v36  ;;  %1581 = vmatprep.subr.mxu1 %v688_v37 }
  0x37   : > { %1556 = vmatprep.mubr.msk.f32.mxu1 %vm327_vm0, %v306_v38  ;;  %1582 = vmatpush3.msra.mxu1 %v688_v37 }
  0x38   : > { %1533 = vmatmul.mubr.msk.f32.gmra.mxu0 %vm327_vm0, %v291_v39  ;;  %1583 = vmatprep.subr.mxu1 %v687_v40 }
  0x39   : > { %1535 = vmatprep.mubr.msk.f32.mxu0 %vm327_vm0, %v292_v41  ;;  %1584 = vmatpush3.msra.mxu1 %v687_v40 }
  0x3a   : > { %1557 = vmatmul.mubr.msk.f32.gmra.mxu1 %vm327_vm0, %v307_v42  ;;  %1585 = vmatprep.subr.mxu1 %v686_v43 }
  0x3b   : > { %1559 = vmatprep.mubr.msk.f32.mxu1 %vm327_vm0, %v308_v44  ;;  %1586 = vmatpush3.msra.mxu1 %v686_v43 }
  0x3c   : > { %1536 = vmatmul.mubr.msk.f32.gmra.mxu0 %vm327_vm0, %v293_v45  ;;  %1587 = vmatprep.subr.mxu1 %v685_v46 }
  0x3d   : > { %1538 = vmatprep.mubr.msk.f32.mxu0 %vm327_vm0, %v294_v47  ;;  %1588 = vmatpush3.msra.mxu1 %v685_v46 }
  0x3e   : > { %1560 = vmatmul.mubr.msk.f32.gmra.mxu1 %vm327_vm0, %v309_v48  ;;  %1589 = vmatprep.subr.mxu1 %v684_v49 }
  0x3f   : > { %1562 = vmatprep.mubr.msk.f32.mxu1 %vm327_vm0, %v310_v50  ;;  %1590 = vmatpush3.msra.mxu1 %v684_v49 }
  0x40   : > { %1539 = vmatmul.mubr.msk.f32.gmra.mxu0 %vm327_vm0, %v295_v51  ;;  %1591 = vmatprep.subr.mxu1 %v683_v53 }
  0x41   : > { %1592 = vmatpush3.msra.mxu1 %v683_v53  ;;  %1645 = vmatprep.subr.mxu0 %v976_v56 }
  0x42   : > { %1563 = vmatmul.mubr.msk.f32.gmra.mxu1 %vm327_vm0, %v311_v52  ;;  %1593 = vmatprep.subr.mxu1 %v682_v54 }
  0x43   : > { %1594 = vmatpush3.msra.mxu1 %v682_v54  ;;  %1646 = vmatpush3.msra.mxu0 %v976_v56 }
  0x44   : > { %1595 = vmatprep.subr.mxu1 %v681_v55  ;;  %1647 = vmatprep.subr.mxu0 %v975_v57 }
  0x45   : > { %1596 = vmatpush3.msra.mxu1 %v681_v55  ;;  %1648 = vmatpush3.msra.mxu0 %v975_v57 }
  0x46   : > { %1649 = vmatprep.subr.mxu0 %v974_v58 }
  0x47   : > { %1650 = vmatpush3.msra.mxu0 %v974_v58 }
  0x48   : > { %1651 = vmatprep.subr.mxu0 %v973_v59 }
  0x49   : > { %1652 = vmatpush3.msra.mxu0 %v973_v59 }
  0x4a   : > { %1653 = vmatprep.subr.mxu0 %v972_v60 }
  0x4b   : > { %1654 = vmatpush3.msra.mxu0 %v972_v60 }
  0x4c   : > { %1655 = vmatprep.subr.mxu0 %v971_v61 }
  0x4d   : > { %1656 = vmatpush3.msra.mxu0 %v971_v61 }
  0x4e   : > { %1657 = vmatprep.subr.mxu0 %v970_v62 }
  0x4f   : > { %1658 = vmatpush3.msra.mxu0 %v970_v62 }
  0x50   : > { %1659 = vmatprep.subr.mxu0 %v969_v63 }
  0x51   : > { %1660 = vmatpush3.msra.mxu0 %v969_v63 }
  0x52   : > { %1661 = vmatprep.subr.mxu0 %v968_v0 }
  0x53   : > { %1662 = vmatpush3.msra.mxu0 %v968_v0 }
  0x54   : > { %1663 = vmatprep.subr.mxu0 %v967_v1 }
  0x55   : > { %1664 = vmatpush3.msra.mxu0 %v967_v1 }
  0x56   : > { %1665 = vmatprep.subr.mxu0 %v966_v2 }
  0x57   : > { %1666 = vmatpush3.msra.mxu0 %v966_v2 }
  0x58   : > { %1667 = vmatprep.subr.mxu0 %v965_v3 }
  0x59   : > { %1668 = vmatpush3.msra.mxu0 %v965_v3 }
  0x5a   : > { %1669 = vmatprep.subr.mxu0 %v964_v4 }
  0x5b   : > { %1670 = vmatpush3.msra.mxu0 %v964_v4 }
  0xe4   : > { %v1519_v6 = vpop.f32.mrf.mxu0 }
  0xe5   : > { %v496_v7 = vadd.f32 %v1519_v6, %v2119_v5 }
  0xe6   : > { %v490_v8 = vpop.f32.mrf.mxu0  ;;  %v2122_v9 = vpop.f32.mrf.mxu1 }
  0xe7   : > { %v491_v10 = vadd.f32 %v2119_v5, %v490_v8  ;;  %v650_v14 = vmax.f32 %v496_v7, 0.0  ;;  %v576_v3 = vadd.f32 %v2122_v9, %v2119_v5 }
  0xe8   : > { %v1522_v11 = vpop.f32.mrf.mxu0  ;;  %v570_v12 = vpop.f32.mrf.mxu1 }
  0xe9   : > { %v649_v13 = vmax.f32 %v491_v10, 0.0  ;;  %v506_v15 = vadd.f32 %v1522_v11, %v2119_v5  ;;  %v571_v57 = vadd.f32 %v2119_v5, %v570_v12  ;;  %v666_v8 = vmax.f32 %v576_v3, 0.0 }
  0xea   : > { %v500_v16 = vpop.f32.mrf.mxu0  ;;  %v2126_v17 = vpop.f32.mrf.mxu1 }
  0xeb   : > { %v501_v18 = vadd.f32 %v2119_v5, %v500_v16  ;;  %1597 = vmatprep.mubr.f32.mxu1 %v649_v13  ;;  %v652_v22 = vmax.f32 %v506_v15, 0.0  ;;  %v665_v0 = vmax.f32 %v571_v57, 0.0  ;;  %v586_v10 = vadd.f32 %v2126_v17, %v2119_v5 }
  0xec   : > { %v1525_v19 = vpop.f32.mrf.mxu0  ;;  %1598 = vmatmul.mubr.f32.vlgmr.msra.gmra.mxu1 %v650_v14  ;;  %v580_v20 = vpop.f32.mrf.mxu1 }
  0xed   : > { %v651_v21 = vmax.f32 %v501_v18, 0.0  ;;  %v516_v23 = vadd.f32 %v1525_v19, %v2119_v5  ;;  %v581_v1 = vadd.f32 %v2119_v5, %v580_v20  ;;  %v668_v14 = vmax.f32 %v586_v10, 0.0 }
  0xee   : > { %v510_v24 = vpop.f32.mrf.mxu0  ;;  %v2130_v25 = vpop.f32.mrf.mxu1 }
  0xef   : > { %v511_v26 = vadd.f32 %v2119_v5, %v510_v24  ;;  %1600 = vmatprep.mubr.f32.mxu1 %v651_v21  ;;  %v654_v29 = vmax.f32 %v516_v23, 0.0  ;;  %v667_v6 = vmax.f32 %v581_v1, 0.0  ;;  %v596_v9 = vadd.f32 %v2130_v25, %v2119_v5 }
  0xf0   : > { %v1528_v27 = vpop.f32.mrf.mxu0  ;;  %1601 = vmatmul.mubr.f32.gmra.mxu1 %v652_v22  ;;  %v590_v32 = vpop.f32.mrf.mxu1 }
  0xf1   : > { %v653_v28 = vmax.f32 %v511_v26, 0.0  ;;  %v526_v30 = vadd.f32 %v1528_v27, %v2119_v5  ;;  %v591_v7 = vadd.f32 %v2119_v5, %v590_v32  ;;  %v670_v19 = vmax.f32 %v596_v9, 0.0 }
  0xf2   : > { %v520_v31 = vpop.f32.mrf.mxu0  ;;  %v1552_v39 = vpop.f32.mrf.mxu1 }
  0xf3   : > { %v521_v33 = vadd.f32 %v2119_v5, %v520_v31  ;;  %1603 = vmatprep.mubr.f32.mxu1 %v653_v28  ;;  %v656_v36 = vmax.f32 %v526_v30, 0.0  ;;  %v669_v12 = vmax.f32 %v591_v7, 0.0  ;;  %v606_v20 = vadd.f32 %v1552_v39, %v2119_v5  ;;  %v963_v39 = vld [vmem:[%s2338_s5 + $0x10] sm:$0xff] }
  0xf4   : > { %v1531_v34 = vpop.f32.mrf.mxu0  ;;  %1604 = vmatmul.mubr.f32.gmra.mxu1 %v654_v29  ;;  %v600_v46 = vpop.f32.mrf.mxu1  ;;  %1671 = vmatprep.subr.mxu0 %v963_v39 }
  0xf5   : > { %v655_v35 = vmax.f32 %v521_v33, 0.0  ;;  %v536_v37 = vadd.f32 %v1531_v34, %v2119_v5  ;;  %v601_v13 = vadd.f32 %v2119_v5, %v600_v46  ;;  %v672_v23 = vmax.f32 %v606_v20, 0.0  ;;  %1672 = vmatpush3.msra.mxu0 %v963_v39 }
  0xf6   : > { %v530_v38 = vpop.f32.mrf.mxu0  ;;  %v1555_v53 = vpop.f32.mrf.mxu1 }
  0xf7   : > { %v531_v40 = vadd.f32 %v2119_v5, %v530_v38  ;;  %1606 = vmatprep.mubr.f32.mxu1 %v655_v35  ;;  %v658_v43 = vmax.f32 %v536_v37, 0.0  ;;  %v671_v16 = vmax.f32 %v601_v13, 0.0  ;;  %v616_v24 = vadd.f32 %v1555_v53, %v2119_v5 }
  0xf8   : > { %v1534_v41 = vpop.f32.mrf.mxu0  ;;  %1607 = vmatmul.mubr.f32.gmra.mxu1 %v656_v36  ;;  %v610_v61 = vpop.f32.mrf.mxu1 }
  0xf9   : > { %v657_v42 = vmax.f32 %v531_v40, 0.0  ;;  %v546_v44 = vadd.f32 %v1534_v41, %v2119_v5  ;;  %v611_v18 = vadd.f32 %v2119_v5, %v610_v61  ;;  %v674_v28 = vmax.f32 %v616_v24, 0.0  ;;  %v962_v40 = vld [vmem:[%s2338_s5 + $0x8] sm:$0xff]  ;;  %v2174_v41 = vld [vmem:[%s2337_s4] ss:$0 sm:$0xff] }
  0xfa   : > { %v540_v45 = vpop.f32.mrf.mxu0  ;;  %v1558_v4 = vpop.f32.mrf.mxu1  ;;  %1673 = vmatprep.subr.mxu0 %v962_v40 }
  0xfb   : > { %v541_v47 = vadd.f32 %v2119_v5, %v540_v45  ;;  %1609 = vmatprep.mubr.f32.mxu1 %v657_v42  ;;  %v660_v50 = vmax.f32 %v546_v44, 0.0  ;;  %v673_v21 = vmax.f32 %v611_v18, 0.0  ;;  %v626_v29 = vadd.f32 %v1558_v4, %v2119_v5  ;;  %1674 = vmatpush3.msra.mxu0 %v962_v40 }
  0xfc   : > { %v1537_v48 = vpop.f32.mrf.mxu0  ;;  %1610 = vmatmul.mubr.f32.gmra.mxu1 %v658_v43  ;;  %v620_v11 = vpop.f32.mrf.mxu1 }
  0xfd   : > { %v659_v49 = vmax.f32 %v541_v47, 0.0  ;;  %v556_v51 = vadd.f32 %v1537_v48, %v2119_v5  ;;  %v621_v22 = vadd.f32 %v2119_v5, %v620_v11  ;;  %v676_v33 = vmax.f32 %v626_v29, 0.0 }
  0xfe   : > { %v550_v52 = vpop.f32.mrf.mxu0  ;;  %v1561_v15 = vpop.f32.mrf.mxu1 }
  0xff   : > { %v551_v54 = vadd.f32 %v2119_v5, %v550_v52  ;;  %1612 = vmatprep.mubr.f32.mxu1 %v659_v49  ;;  %v662_v58 = vmax.f32 %v556_v51, 0.0  ;;  %v675_v25 = vmax.f32 %v621_v22, 0.0  ;;  %v636_v34 = vadd.f32 %v1561_v15, %v2119_v5 }
 0x100   : > { %v1540_v55 = vpop.f32.mrf.mxu0  ;;  %1613 = vmatmul.mubr.f32.gmra.mxu1 %v660_v50  ;;  %v630_v17 = vpop.f32.mrf.mxu1 }
 0x101   : > { %v661_v56 = vmax.f32 %v551_v54, 0.0  ;;  %v566_v59 = vadd.f32 %v1540_v55, %v2119_v5  ;;  %v631_v27 = vadd.f32 %v2119_v5, %v630_v17  ;;  %v678_v36 = vmax.f32 %v636_v34, 0.0 }
 0x102   : > { %v560_v60 = vpop.f32.mrf.mxu0  ;;  %v1564_v26 = vpop.f32.mrf.mxu1 }
 0x103   : > { %v561_v62 = vadd.f32 %v2119_v5, %v560_v60  ;;  %1615 = vmatprep.mubr.f32.mxu1 %v661_v56  ;;  %v664_v2 = vmax.f32 %v566_v59, 0.0  ;;  %v677_v31 = vmax.f32 %v631_v27, 0.0  ;;  %v646_v37 = vadd.f32 %v1564_v26, %v2119_v5 }
 0x104   : > { %1616 = vmatmul.mubr.f32.gmra.mxu1 %v662_v58  ;;  %v640_v30 = vpop.f32.mrf.mxu1 }
 0x105   : > { %v663_v63 = vmax.f32 %v561_v62, 0.0  ;;  %v641_v32 = vadd.f32 %v2119_v5, %v640_v30  ;;  %v680_v38 = vmax.f32 %v646_v37, 0.0  ;;  %v961_v5 = vld [vmem:[%s2338_s5] sm:$0xff] }
 0x106   : > { %1675 = vmatprep.subr.mxu0 %v961_v5 }
 0x107   : > { %1618 = vmatprep.mubr.f32.mxu1 %v663_v63  ;;  %v679_v35 = vmax.f32 %v641_v32, 0.0  ;;  %1676 = vmatpush3.msra.mxu0 %v961_v5 }
 0x108   : > { %1619 = vmatmul.mubr.f32.gmra.mxu1 %v664_v2 }
 0x109   : > { %1621 = vmatprep.mubr.f32.mxu1 %v665_v0 }
 0x10c   : > { %1622 = vmatmul.mubr.f32.gmra.mxu1 %v666_v8 }
 0x10d   : > { %1624 = vmatprep.mubr.f32.mxu1 %v667_v6 }
 0x110   : > { %1625 = vmatmul.mubr.f32.gmra.mxu1 %v668_v14 }
 0x111   : > { %1627 = vmatprep.mubr.f32.mxu1 %v669_v12 }
 0x114   : > { %1628 = vmatmul.mubr.f32.gmra.mxu1 %v670_v19 }
 0x115   : > { %1630 = vmatprep.mubr.f32.mxu1 %v671_v16 }
 0x118   : > { %1631 = vmatmul.mubr.f32.gmra.mxu1 %v672_v23 }
 0x119   : > { %1633 = vmatprep.mubr.f32.mxu1 %v673_v21 }
 0x11c   : > { %1634 = vmatmul.mubr.f32.gmra.mxu1 %v674_v28 }
 0x11d   : > { %1636 = vmatprep.mubr.f32.mxu1 %v675_v25 }
 0x120   : > { %1637 = vmatmul.mubr.f32.gmra.mxu1 %v676_v33 }
 0x121   : > { %1639 = vmatprep.mubr.f32.mxu1 %v677_v31 }
 0x124   : > { %1640 = vmatmul.mubr.f32.gmra.mxu1 %v678_v36 }
 0x125   : > { %1642 = vmatprep.mubr.f32.mxu1 %v679_v35 }
 0x128   : > { %1643 = vmatmul.mubr.f32.gmra.mxu1 %v680_v38 }
 0x1ac   : > { %v1599_v42 = vpop.f32.mrf.mxu1 }
 0x1ad   : > { %v776_v43 = vadd.f32 %v1599_v42, %v2174_v41 }
 0x1ae   : > { %v770_v44 = vpop.f32.mrf.mxu1 }
 0x1af   : > { %v771_v45 = vadd.f32 %v2174_v41, %v770_v44  ;;  %v930_v48 = vmax.f32 %v776_v43, 0.0 }
 0x1b0   : > { %v1602_v46 = vpop.f32.mrf.mxu1 }
 0x1b1   : > { %v929_v47 = vmax.f32 %v771_v45, 0.0  ;;  %v786_v49 = vadd.f32 %v1602_v46, %v2174_v41 }
 0x1b2   : > { %v780_v50 = vpop.f32.mrf.mxu1 }
 0x1b3   : > { %v781_v51 = vadd.f32 %v2174_v41, %v780_v50  ;;  %1677 = vmatprep.mubr.f32.mxu0 %v929_v47  ;;  %v932_v54 = vmax.f32 %v786_v49, 0.0 }
 0x1b4   : > { %v1605_v52 = vpop.f32.mrf.mxu1  ;;  %1678 = vmatmul.mubr.f32.vlgmr.msra.gmra.mxu0 %v930_v48 }
 0x1b5   : > { %v931_v53 = vmax.f32 %v781_v51, 0.0  ;;  %v796_v55 = vadd.f32 %v1605_v52, %v2174_v41 }
 0x1b6   : > { %v790_v56 = vpop.f32.mrf.mxu1 }
 0x1b7   : > { %v791_v57 = vadd.f32 %v2174_v41, %v790_v56  ;;  %1680 = vmatprep.mubr.f32.mxu0 %v931_v53  ;;  %v934_v60 = vmax.f32 %v796_v55, 0.0 }
 0x1b8   : > { %v1608_v58 = vpop.f32.mrf.mxu1  ;;  %1681 = vmatmul.mubr.f32.gmra.mxu0 %v932_v54 }
 0x1b9   : > { %v933_v59 = vmax.f32 %v791_v57, 0.0  ;;  %v806_v61 = vadd.f32 %v1608_v58, %v2174_v41 }
 0x1ba   : > { %v800_v62 = vpop.f32.mrf.mxu1 }
 0x1bb   : > { %v801_v63 = vadd.f32 %v2174_v41, %v800_v62  ;;  %1683 = vmatprep.mubr.f32.mxu0 %v933_v59  ;;  %v936_v2 = vmax.f32 %v806_v61, 0.0 }
 0x1bc   : > { %v1611_v0 = vpop.f32.mrf.mxu1  ;;  %1684 = vmatmul.mubr.f32.gmra.mxu0 %v934_v60 }
 0x1bd   : > { %v935_v1 = vmax.f32 %v801_v63, 0.0  ;;  %v816_v3 = vadd.f32 %v1611_v0, %v2174_v41 }
 0x1be   : > { %v810_v4 = vpop.f32.mrf.mxu1 }
 0x1bf   : > { %v811_v6 = vadd.f32 %v2174_v41, %v810_v4  ;;  %1686 = vmatprep.mubr.f32.mxu0 %v935_v1  ;;  %v938_v10 = vmax.f32 %v816_v3, 0.0 }
 0x1c0   : > { %v1614_v7 = vpop.f32.mrf.mxu1  ;;  %1687 = vmatmul.mubr.f32.gmra.mxu0 %v936_v2 }
 0x1c1   : > { %v937_v8 = vmax.f32 %v811_v6, 0.0  ;;  %v826_v11 = vadd.f32 %v1614_v7, %v2174_v41 }
 0x1c2   : > { %v820_v12 = vpop.f32.mrf.mxu1 }
 0x1c3   : > { %v821_v13 = vadd.f32 %v2174_v41, %v820_v12  ;;  %1689 = vmatprep.mubr.f32.mxu0 %v937_v8  ;;  %v940_v15 = vmax.f32 %v826_v11, 0.0 }
 0x1c4   : > { %v1617_v14 = vpop.f32.mrf.mxu1  ;;  %1690 = vmatmul.mubr.f32.gmra.mxu0 %v938_v10 }
 0x1c5   : > { %v939_v9 = vmax.f32 %v821_v13, 0.0  ;;  %v836_v16 = vadd.f32 %v1617_v14, %v2174_v41  ;;  %v2214_v13 = vld [vmem:[%s2339_s6] ss:$0 sm:$0xff] }
 0x1c6   : > { %v830_v18 = vpop.f32.mrf.mxu1 }
 0x1c7   : > { %v831_v19 = vadd.f32 %v2174_v41, %v830_v18  ;;  %1692 = vmatprep.mubr.f32.mxu0 %v939_v9  ;;  %v942_v21 = vmax.f32 %v836_v16, 0.0 }
 0x1c8   : > { %v1620_v20 = vpop.f32.mrf.mxu1  ;;  %1693 = vmatmul.mubr.f32.gmra.mxu0 %v940_v15 }
 0x1c9   : > { %v941_v17 = vmax.f32 %v831_v19, 0.0  ;;  %v846_v22 = vadd.f32 %v1620_v20, %v2174_v41 }
 0x1ca   : > { %v840_v23 = vpop.f32.mrf.mxu1 }
 0x1cb   : > { %v841_v24 = vadd.f32 %v2174_v41, %v840_v23  ;;  %1695 = vmatprep.mubr.f32.mxu0 %v941_v17  ;;  %v944_v27 = vmax.f32 %v846_v22, 0.0 }
 0x1cc   : > { %v1623_v26 = vpop.f32.mrf.mxu1  ;;  %1696 = vmatmul.mubr.f32.gmra.mxu0 %v942_v21 }
 0x1cd   : > { %v943_v25 = vmax.f32 %v841_v24, 0.0  ;;  %v856_v28 = vadd.f32 %v1623_v26, %v2174_v41 }
 0x1ce   : > { %v850_v29 = vpop.f32.mrf.mxu1 }
 0x1cf   : > { %v851_v30 = vadd.f32 %v2174_v41, %v850_v29  ;;  %1698 = vmatprep.mubr.f32.mxu0 %v943_v25  ;;  %v946_v33 = vmax.f32 %v856_v28, 0.0 }
 0x1d0   : > { %v1626_v31 = vpop.f32.mrf.mxu1  ;;  %1699 = vmatmul.mubr.f32.gmra.mxu0 %v944_v27 }
 0x1d1   : > { %v945_v32 = vmax.f32 %v851_v30, 0.0  ;;  %v866_v34 = vadd.f32 %v1626_v31, %v2174_v41 }
 0x1d2   : > { %v860_v35 = vpop.f32.mrf.mxu1 }
 0x1d3   : > { %v861_v36 = vadd.f32 %v2174_v41, %v860_v35  ;;  %1701 = vmatprep.mubr.f32.mxu0 %v945_v32  ;;  %v948_v39 = vmax.f32 %v866_v34, 0.0 }
 0x1d4   : > { %v1629_v37 = vpop.f32.mrf.mxu1  ;;  %1702 = vmatmul.mubr.f32.gmra.mxu0 %v946_v33 }
 0x1d5   : > { %v947_v38 = vmax.f32 %v861_v36, 0.0  ;;  %v876_v40 = vadd.f32 %v1629_v37, %v2174_v41 }
 0x1d6   : > { %v870_v5 = vpop.f32.mrf.mxu1 }
 0x1d7   : > { %v871_v42 = vadd.f32 %v2174_v41, %v870_v5  ;;  %1704 = vmatprep.mubr.f32.mxu0 %v947_v38  ;;  %v950_v45 = vmax.f32 %v876_v40, 0.0 }
 0x1d8   : > { %v1632_v43 = vpop.f32.mrf.mxu1  ;;  %1705 = vmatmul.mubr.f32.gmra.mxu0 %v948_v39 }
 0x1d9   : > { %v949_v44 = vmax.f32 %v871_v42, 0.0  ;;  %v886_v46 = vadd.f32 %v1632_v43, %v2174_v41 }
 0x1da   : > { %v880_v47 = vpop.f32.mrf.mxu1 }
 0x1db   : > { %v881_v48 = vadd.f32 %v2174_v41, %v880_v47  ;;  %1707 = vmatprep.mubr.f32.mxu0 %v949_v44  ;;  %v952_v51 = vmax.f32 %v886_v46, 0.0 }
 0x1dc   : > { %v1635_v49 = vpop.f32.mrf.mxu1  ;;  %1708 = vmatmul.mubr.f32.gmra.mxu0 %v950_v45 }
 0x1dd   : > { %v951_v50 = vmax.f32 %v881_v48, 0.0  ;;  %v896_v52 = vadd.f32 %v1635_v49, %v2174_v41 }
 0x1de   : > { %v890_v53 = vpop.f32.mrf.mxu1 }
 0x1df   : > { %v891_v54 = vadd.f32 %v2174_v41, %v890_v53  ;;  %1710 = vmatprep.mubr.f32.mxu0 %v951_v50  ;;  %v954_v57 = vmax.f32 %v896_v52, 0.0 }
 0x1e0   : > { %v1638_v55 = vpop.f32.mrf.mxu1  ;;  %1711 = vmatmul.mubr.f32.gmra.mxu0 %v952_v51 }
 0x1e1   : > { %v953_v56 = vmax.f32 %v891_v54, 0.0  ;;  %v906_v58 = vadd.f32 %v1638_v55, %v2174_v41 }
 0x1e2   : > { %v900_v59 = vpop.f32.mrf.mxu1 }
 0x1e3   : > { %v901_v60 = vadd.f32 %v2174_v41, %v900_v59  ;;  %1713 = vmatprep.mubr.f32.mxu0 %v953_v56  ;;  %v956_v63 = vmax.f32 %v906_v58, 0.0 }
 0x1e4   : > { %v1641_v61 = vpop.f32.mrf.mxu1  ;;  %1714 = vmatmul.mubr.f32.gmra.mxu0 %v954_v57 }
 0x1e5   : > { %v955_v62 = vmax.f32 %v901_v60, 0.0  ;;  %v916_v0 = vadd.f32 %v1641_v61, %v2174_v41 }
 0x1e6   : > { %v910_v1 = vpop.f32.mrf.mxu1 }
 0x1e7   : > { %v911_v2 = vadd.f32 %v2174_v41, %v910_v1  ;;  %1716 = vmatprep.mubr.f32.mxu0 %v955_v62  ;;  %v958_v6 = vmax.f32 %v916_v0, 0.0 }
 0x1e8   : > { %v1644_v3 = vpop.f32.mrf.mxu1  ;;  %1717 = vmatmul.mubr.f32.gmra.mxu0 %v956_v63 }
 0x1e9   : > { %v957_v4 = vmax.f32 %v911_v2, 0.0  ;;  %v926_v7 = vadd.f32 %v1644_v3, %v2174_v41 }
 0x1ea   : > { %v920_v8 = vpop.f32.mrf.mxu1 }
 0x1eb   : > { %v921_v10 = vadd.f32 %v2174_v41, %v920_v8  ;;  %1719 = vmatprep.mubr.f32.mxu0 %v957_v4  ;;  %v960_v12 = vmax.f32 %v926_v7, 0.0 }
 0x1ec   : > { %1720 = vmatmul.mubr.f32.gmra.mxu0 %v958_v6 }
 0x1ed   : > { %v959_v11 = vmax.f32 %v921_v10, 0.0 }
 0x1ef   : > { %1722 = vmatprep.mubr.f32.mxu0 %v959_v11 }
 0x1f0   : > { %1723 = vmatmul.mubr.f32.gmra.mxu0 %v960_v12 }
 0x274   : > { %v1679_v14 = vpop.f32.mrf.mxu0 }
 0x275   : > { %v1056_v9 = vadd.f32 %v1679_v14, %v2214_v13 }
 0x276   : > { %v1050_v15 = vpop.f32.mrf.mxu0 }
 0x277   : > { %1210 = vst [vmem:[%s2217_s29 + $0x8] sm:$0xff] %v1056_v9  ;;  %v1051_v41 = vadd.f32 %v2214_v13, %v1050_v15 }
 0x278   : > { %v1682_v16 = vpop.f32.mrf.mxu0 }
 0x279   : > { %1209 = vst [vmem:[%s2217_s29] sm:$0xff] %v1051_v41  ;;  %v1066_v18 = vadd.f32 %v1682_v16, %v2214_v13 }
 0x27a   : > { %v1060_v19 = vpop.f32.mrf.mxu0 }
 0x27b   : > { %1212 = vst [vmem:[%s2217_s29 + $0x18] sm:$0xff] %v1066_v18  ;;  %v1061_v20 = vadd.f32 %v2214_v13, %v1060_v19 }
 0x27c   : > { %v1685_v17 = vpop.f32.mrf.mxu0 }
 0x27d   : > { %1211 = vst [vmem:[%s2217_s29 + $0x10] sm:$0xff] %v1061_v20  ;;  %v1076_v21 = vadd.f32 %v1685_v17, %v2214_v13 }
 0x27e   : > { %v1070_v22 = vpop.f32.mrf.mxu0 }
 0x27f   : > { %1214 = vst [vmem:[%s2217_s29 + $0x28] sm:$0xff] %v1076_v21  ;;  %v1071_v23 = vadd.f32 %v2214_v13, %v1070_v22 }
 0x280   : > { %v1688_v24 = vpop.f32.mrf.mxu0 }
 0x281   : > { %1213 = vst [vmem:[%s2217_s29 + $0x20] sm:$0xff] %v1071_v23  ;;  %v1086_v26 = vadd.f32 %v1688_v24, %v2214_v13 }
 0x282   : > { %v1080_v25 = vpop.f32.mrf.mxu0 }
 0x283   : > { %1216 = vst [vmem:[%s2217_s29 + $0x38] sm:$0xff] %v1086_v26  ;;  %v1081_v27 = vadd.f32 %v2214_v13, %v1080_v25 }
 0x284   : > { %v1691_v28 = vpop.f32.mrf.mxu0 }
 0x285   : > { %1215 = vst [vmem:[%s2217_s29 + $0x30] sm:$0xff] %v1081_v27  ;;  %v1096_v29 = vadd.f32 %v1691_v28, %v2214_v13 }
 0x286   : > { %v1090_v30 = vpop.f32.mrf.mxu0 }
 0x287   : > { %1218 = vst [vmem:[%s2217_s29 + $0x48] sm:$0xff] %v1096_v29  ;;  %v1091_v31 = vadd.f32 %v2214_v13, %v1090_v30 }
 0x288   : > { %v1694_v32 = vpop.f32.mrf.mxu0 }
 0x289   : > { %1217 = vst [vmem:[%s2217_s29 + $0x40] sm:$0xff] %v1091_v31  ;;  %v1106_v33 = vadd.f32 %v1694_v32, %v2214_v13 }
 0x28a   : > { %v1100_v34 = vpop.f32.mrf.mxu0 }
 0x28b   : > { %1220 = vst [vmem:[%s2217_s29 + $0x58] sm:$0xff] %v1106_v33  ;;  %v1101_v35 = vadd.f32 %v2214_v13, %v1100_v34 }
 0x28c   : > { %v1697_v36 = vpop.f32.mrf.mxu0 }
 0x28d   : > { %1219 = vst [vmem:[%s2217_s29 + $0x50] sm:$0xff] %v1101_v35  ;;  %v1116_v37 = vadd.f32 %v1697_v36, %v2214_v13 }
 0x28e   : > { %v1110_v38 = vpop.f32.mrf.mxu0 }
 0x28f   : > { %1222 = vst [vmem:[%s2217_s29 + $0x68] sm:$0xff] %v1116_v37  ;;  %v1111_v39 = vadd.f32 %v2214_v13, %v1110_v38 }
 0x290   : > { %v1700_v40 = vpop.f32.mrf.mxu0 }
 0x291   : > { %1221 = vst [vmem:[%s2217_s29 + $0x60] sm:$0xff] %v1111_v39  ;;  %v1126_v5 = vadd.f32 %v1700_v40, %v2214_v13 }
 0x292   : > { %v1120_v42 = vpop.f32.mrf.mxu0 }
 0x293   : > { %1224 = vst [vmem:[%s2217_s29 + $0x78] sm:$0xff] %v1126_v5  ;;  %v1121_v43 = vadd.f32 %v2214_v13, %v1120_v42 }
 0x294   : > { %v1703_v44 = vpop.f32.mrf.mxu0 }
 0x295   : > { %1223 = vst [vmem:[%s2217_s29 + $0x70] sm:$0xff] %v1121_v43  ;;  %v1136_v45 = vadd.f32 %v1703_v44, %v2214_v13 }
 0x296   : > { %v1130_v46 = vpop.f32.mrf.mxu0 }
 0x297   : > { %1226 = vst [vmem:[%s2217_s29 + $0x88] sm:$0xff] %v1136_v45  ;;  %v1131_v47 = vadd.f32 %v2214_v13, %v1130_v46 }
 0x298   : > { %v1706_v48 = vpop.f32.mrf.mxu0 }
 0x299   : > { %1225 = vst [vmem:[%s2217_s29 + $0x80] sm:$0xff] %v1131_v47  ;;  %v1146_v49 = vadd.f32 %v1706_v48, %v2214_v13 }
 0x29a   : > { %v1140_v50 = vpop.f32.mrf.mxu0 }
 0x29b   : > { %1228 = vst [vmem:[%s2217_s29 + $0x98] sm:$0xff] %v1146_v49  ;;  %v1141_v51 = vadd.f32 %v2214_v13, %v1140_v50 }
 0x29c   : > { %v1709_v52 = vpop.f32.mrf.mxu0 }
 0x29d   : > { %1227 = vst [vmem:[%s2217_s29 + $0x90] sm:$0xff] %v1141_v51  ;;  %v1156_v53 = vadd.f32 %v1709_v52, %v2214_v13 }
 0x29e   : > { %v1150_v54 = vpop.f32.mrf.mxu0 }
 0x29f   : > { %1230 = vst [vmem:[%s2217_s29 + $0xa8] sm:$0xff] %v1156_v53  ;;  %v1151_v55 = vadd.f32 %v2214_v13, %v1150_v54 }
 0x2a0   : > { %v1712_v56 = vpop.f32.mrf.mxu0 }
 0x2a1   : > { %1229 = vst [vmem:[%s2217_s29 + $0xa0] sm:$0xff] %v1151_v55  ;;  %v1166_v57 = vadd.f32 %v1712_v56, %v2214_v13 }
 0x2a2   : > { %v1160_v58 = vpop.f32.mrf.mxu0 }
 0x2a3   : > { %1232 = vst [vmem:[%s2217_s29 + $0xb8] sm:$0xff] %v1166_v57  ;;  %v1161_v59 = vadd.f32 %v2214_v13, %v1160_v58 }
 0x2a4   : > { %v1715_v60 = vpop.f32.mrf.mxu0 }
 0x2a5   : > { %1231 = vst [vmem:[%s2217_s29 + $0xb0] sm:$0xff] %v1161_v59  ;;  %v1176_v61 = vadd.f32 %v1715_v60, %v2214_v13 }
 0x2a6   : > { %v1170_v62 = vpop.f32.mrf.mxu0 }
 0x2a7   : > { %1234 = vst [vmem:[%s2217_s29 + $0xc8] sm:$0xff] %v1176_v61  ;;  %v1171_v63 = vadd.f32 %v2214_v13, %v1170_v62 }
 0x2a8   : > { %v1718_v0 = vpop.f32.mrf.mxu0 }
 0x2a9   : > { %1233 = vst [vmem:[%s2217_s29 + $0xc0] sm:$0xff] %v1171_v63  ;;  %v1186_v1 = vadd.f32 %v1718_v0, %v2214_v13 }
 0x2aa   : > { %v1180_v2 = vpop.f32.mrf.mxu0 }
 0x2ab   : > { %1236 = vst [vmem:[%s2217_s29 + $0xd8] sm:$0xff] %v1186_v1  ;;  %v1181_v3 = vadd.f32 %v2214_v13, %v1180_v2 }
 0x2ac   : > { %v1721_v4 = vpop.f32.mrf.mxu0 }
 0x2ad   : > { %1235 = vst [vmem:[%s2217_s29 + $0xd0] sm:$0xff] %v1181_v3  ;;  %v1196_v6 = vadd.f32 %v1721_v4, %v2214_v13 }
 0x2ae   : > { %v1190_v7 = vpop.f32.mrf.mxu0 }
 0x2af   : > { %1238 = vst [vmem:[%s2217_s29 + $0xe8] sm:$0xff] %v1196_v6  ;;  %v1191_v8 = vadd.f32 %v2214_v13, %v1190_v7 }
 0x2b0   : > { %v1724_v10 = vpop.f32.mrf.mxu0 }
 0x2b1   : > { %1237 = vst [vmem:[%s2217_s29 + $0xe0] sm:$0xff] %v1191_v8  ;;  %v1206_v11 = vadd.f32 %v1724_v10, %v2214_v13 }
 0x2b2   : > { %v1200_v12 = vpop.f32.mrf.mxu0 }
 0x2b3   : > { %1240 = vst [vmem:[%s2217_s29 + $0xf8] sm:$0xff] %v1206_v11  ;;  %v1201_v14 = vadd.f32 %v2214_v13, %v1200_v12 }
 0x2b5   : > { %1239 = vst [vmem:[%s2217_s29 + $0xf0] sm:$0xff] %v1201_v14 }
 0x2b6   : > { %1795 = shalt.err (!%p1792_p3)
}
 0x2b7   : > { %s1796_s20 = scalar_lea.hbm %s2284_s15, 4096  ;;  %s1800_s23 = scalar_lea.hbm %s2340_s7, 16384 }
 0x2b8   : > { %p1797_p4 = scmp.ne.s32.totalorder %s2284_s15, %s1796_s20  ;;  %p1801_p9 = scmp.lt.s32.totalorder %s2284_s15, %s2340_s7 }
 0x2b9   : > { %p1802_p10 = scmp.lt.s32.totalorder %s1800_s23, %s1796_s20 }
 0x2ba   : > { %p1798_p7 = pnand %p1797_p4, %p1925_p5 }
 0x2bb   : > { %p1803_p11 = por %p1802_p10, %p1801_p9 }
 0x2bc   : > { %p1799_p8 = pneg %p1798_p7 }
 0x2be   : > { %p1804_p12 = pnand %p1803_p11, %p1799_p8 }
 0x2c0   : > { %1807 = shalt.err (!%p1804_p12)
}
 0x2c1   : > { %s1845_s9 = smov 128   ;;  %s1846_s14 = smov 8  }
 0x2c2   : > { %1741 = dma.vmem_to_hbm [thread:$0]  (%p1925_p5), %s2286_s13, 4096, %s2284_s15, %s2293_s28, %s1845_s9, %s1845_s9, %s1846_s14  }
 0x2c3 PF: > { %p1747_p13 = scmp.ge.s32.totalorder %s1842_s27, 2  ;;  %s1270_s16 = sand.u32 1, %s1830_s24  }
 0x2c4   : > { %s1271_s17 = scalar_lea.sflag [#allocation3], %s1270_s16 }
 0x2c5   : > { %p1744_p0 = pnand %p1747_p13, %p1929_p6 }
 0x2c7   : > { %p1745_p1 = pneg %p1744_p0 }
 0x2c9   : > { %1825 = dma.done.wait (%p1745_p1), %s1271_s17, 4096  }
 0x2ca   : > { %1827 = vsyncadd (%p1745_p1), %s1271_s17, 4294963200  ;;  %p17_p2 = scmp.ge.s32.totalorder %s1912_s30, 6   ;;  %s2343_s24 = smov %s1834_s25 }
 0x2cb   : > { %s2344_s25 = smov %s1838_s26  ;;  %s2345_s26 = smov %s1923_s10 }
 0x2cc   : > { %s2346_s27 = smov %s1912_s30  ;;  %19 = sbr.rel (!%p17_p2) target bundleno = 3 (0x3), region = 83 }
 0x2d1   :  { %1276 = vsyncpa [#allocation3], 1 }
 0x2d2   :  { %1278 = vsyncpa [#allocation3 + $0x1], 1 }

</bundles_post_ra>
